<compile_context>
chip_gen: v5e
topology: v5e:2x2
jax: 0.10.0
libtpu: 0.0.40
codegen_flags: <defaults>
</compile_context>

<pallas_src>
import jax
import jax.numpy as jnp
from jax import lax
from jax.experimental import pallas as pl
from jax.experimental.pallas import tpu as pltpu


def _attention_kernel_q1(h_ref, e_ref, o_ref):
    """Decoder-step path (Q == 1): VPU/XLU only, no MXU, no relayouts.

    h_ref: (B, 1, H), e_ref: (B, S, H), o_ref: (B, 1, H).
    """
    h = h_ref[...].astype(jnp.float32)                  # (B, 1, H)
    e = e_ref[...].astype(jnp.float32)                  # (B, S, H)

    # scores[b, s] = sum_h h[b, 0, h] * e[b, s, h]
    # sublane-broadcast of the single query row over S, multiply on the VPU,
    # lane-reduce over H on the XLU.  MXU would be <1/8 filled here and would
    # cost two push/FIFO round-trips in a latency-bound kernel.
    scores = jnp.sum(h * e, axis=-1, keepdims=True)     # (B, S, 1)

    # Numerically-stable softmax over S (sublane axis).  Exact normalization
    # (divide, not the approximate EUP reciprocal) so rows sum to 1.
    m = jnp.max(scores, axis=1, keepdims=True)          # (B, 1, 1)
    p = jnp.exp(scores - m)                             # (B, S, 1)
    denom = jnp.sum(p, axis=1, keepdims=True)           # (B, 1, 1)
    weights = p / denom                                 # (B, S, 1)

    # ctx[b, h] = sum_s weights[b, s] * e[b, s, h]
    # lane-broadcast of weights over H, sublane reduce over S.
    ctx = jnp.sum(weights * e, axis=1, keepdims=True)   # (B, 1, H)

    # Single store of the whole output slab.
    o_ref[...] = jnp.tanh(ctx).astype(o_ref.dtype)


def _attention_kernel_mxu(h_ref, e_ref, o_ref):
    """General-Q path: batched MXU matmuls via explicit dot_general.

    h_ref: (B, Q, H), e_ref: (B, S, H), o_ref: (B, Q, H).
    """
    h = h_ref[...].astype(jnp.float32)
    e = e_ref[...].astype(jnp.float32)

    # scores[b,q,s] = sum_h h[b,q,h] * e[b,s,h]
    # Both operands contract their trailing (lane) dim -> transposed-RHS MXU
    # path; e^T is never materialized.
    scores = lax.dot_general(
        h, e,
        dimension_numbers=(((2,), (2,)), ((0,), (0,))),
        preferred_element_type=jnp.float32)              # (B, Q, S)

    m = jnp.max(scores, axis=-1, keepdims=True)
    p = jnp.exp(scores - m)
    weights = p / jnp.sum(p, axis=-1, keepdims=True)     # exact softmax

    # ctx[b,q,h] = sum_s weights[b,q,s] * e[b,s,h]
    ctx = lax.dot_general(
        weights, e,
        dimension_numbers=(((2,), (1,)), ((0,), (0,))),
        preferred_element_type=jnp.float32)              # (B, Q, H)

    o_ref[...] = jnp.tanh(ctx).astype(o_ref.dtype)


@jax.jit
def attention_forward(hidden, encoder_output):
    """hidden: (Q, B, H); encoder_output: (B, S, H). Returns (Q, B, H)."""
    Q, B, H = hidden.shape
    Be, S, He = encoder_output.shape
    assert Be == B and He == H

    itemsize = jnp.dtype(hidden.dtype).itemsize
    cost = pl.CostEstimate(
        flops=4 * B * Q * S * H,                 # two batched contractions
        transcendentals=B * Q * (S + H),         # exp over S + tanh over H per row
        bytes_accessed=itemsize * (2 * B * Q * H + B * S * H),
    )
    vmem = pl.BlockSpec(memory_space=pltpu.MemorySpace.VMEM)

    if Q == 1:
        # (1, B, H) -> (B, 1, H): identical memory order => free reshape,
        # no HBM transpose copy on either side of the kernel.
        h_b1h = hidden.reshape(B, 1, H)
        out_b1h = pl.pallas_call(
            _attention_kernel_q1,
            out_shape=jax.ShapeDtypeStruct((B, 1, H), hidden.dtype),
            in_specs=[vmem, vmem],
            out_specs=vmem,
            cost_estimate=cost,
        )(h_b1h, encoder_output)
        return out_b1h.reshape(1, B, H)

    # General Q > 1 path.  The wrapper permutes here are real XLA copies;
    # TODO(synk): fold the (Q,B,H)<->(B,Q,H) relayout into the kernel (or the
    # surrounding decoder step) for Q>1 to avoid the extra HBM round trips.
    h_bqh = jnp.transpose(hidden, (1, 0, 2))
    out_bqh = pl.pallas_call(
        _attention_kernel_mxu,
        out_shape=jax.ShapeDtypeStruct((B, Q, H), hidden.dtype),
        in_specs=[vmem, vmem],
        out_specs=vmem,
        cost_estimate=cost,
    )(h_bqh, encoder_output)
    return jnp.transpose(out_bqh, (1, 0, 2))


def attention_ref(hidden, encoder_output):
    """Pure-JAX reference mirroring the PyTorch forward."""
    h = jnp.transpose(hidden, (1, 0, 2))                     # (B, Q, H)
    scores = jnp.einsum("bqh,bsh->bqs", h, encoder_output)   # (B, Q, S)
    weights = jax.nn.softmax(scores, axis=-1)
    ctx = jnp.einsum("bqs,bsh->bqh", weights, encoder_output)
    return jnp.tanh(jnp.transpose(ctx, (1, 0, 2)))           # (Q, B, H)


if __name__ == "__main__":
    # Small shapes: batch=2, src_len=8, hid_dim=32, decoder query len=1
    B, S, H, Q = 2, 8, 32, 1
    key = jax.random.PRNGKey(0)
    k1, k2 = jax.random.split(key)
    hidden = jax.random.normal(k1, (Q, B, H), dtype=jnp.float32)          # (Q, B, H)
    encoder_output = jax.random.normal(k2, (B, S, H), dtype=jnp.float32)  # (B, S, H)

    out = jax.block_until_ready(attention_forward(hidden, encoder_output))
    ref = attention_ref(hidden, encoder_output)

    assert out.shape == (Q, B, H)
    # All math is exact f32 (exact softmax divide); tolerance only covers tiny
    # transcendental (exp/tanh) implementation differences.  Real bugs would
    # show up as O(1e-1) errors.
    assert jnp.allclose(out, ref, atol=1e-4, rtol=1e-4), "mismatch vs reference"

    print("KERNEL_OK")
</pallas_src>

<mosaic_0001>
module attributes {stable_mosaic.version = 11 : i64} {
  func.func @_attention_kernel_q1(%arg0: memref<2x1x32xf32, #tpu.memory_space<vmem>>, %arg1: memref<2x8x32xf32, #tpu.memory_space<vmem>>, %arg2: memref<2x1x32xf32, #tpu.memory_space<vmem>>) attributes {dimension_semantics = [], scalar_prefetch = 0 : i64, scratch_operands = 0 : i64, tpu.core_type = #tpu.core_type<tc>} {
    %c0 = arith.constant 0 : index
    %c0_0 = arith.constant 0 : index
    %c0_1 = arith.constant 0 : index
    %0 = vector.load %arg0[%c0, %c0_0, %c0_1] : memref<2x1x32xf32, #tpu.memory_space<vmem>>, vector<2x1x32xf32>
    %c0_2 = arith.constant 0 : index
    %c0_3 = arith.constant 0 : index
    %c0_4 = arith.constant 0 : index
    %1 = vector.load %arg1[%c0_2, %c0_3, %c0_4] : memref<2x8x32xf32, #tpu.memory_space<vmem>>, vector<2x8x32xf32>
    %2 = vector.broadcast %0 : vector<2x1x32xf32> to vector<2x8x32xf32>
    %3 = arith.mulf %2, %1 : vector<2x8x32xf32>
    %cst = arith.constant dense<0.000000e+00> : vector<2x8xf32>
    %4 = vector.multi_reduction <add>, %3, %cst [2] : vector<2x8x32xf32> to vector<2x8xf32>
    %5 = vector.shape_cast %4 : vector<2x8xf32> to vector<2x8x1xf32>
    %cst_5 = arith.constant dense<0xFF800000> : vector<2x1xf32>
    %6 = vector.multi_reduction <maximumf>, %5, %cst_5 [1] : vector<2x8x1xf32> to vector<2x1xf32>
    %7 = vector.shape_cast %6 : vector<2x1xf32> to vector<2x1x1xf32>
    %8 = vector.broadcast %7 : vector<2x1x1xf32> to vector<2x8x1xf32>
    %9 = arith.subf %5, %8 : vector<2x8x1xf32>
    %10 = math.exp %9 : vector<2x8x1xf32>
    %cst_6 = arith.constant dense<0.000000e+00> : vector<2x1xf32>
    %11 = vector.multi_reduction <add>, %10, %cst_6 [1] : vector<2x8x1xf32> to vector<2x1xf32>
    %12 = vector.shape_cast %11 : vector<2x1xf32> to vector<2x1x1xf32>
    %13 = vector.broadcast %12 : vector<2x1x1xf32> to vector<2x8x1xf32>
    %14 = arith.divf %10, %13 : vector<2x8x1xf32>
    %15 = vector.broadcast %14 : vector<2x8x1xf32> to vector<2x8x32xf32>
    %16 = arith.mulf %15, %1 : vector<2x8x32xf32>
    %cst_7 = arith.constant dense<0.000000e+00> : vector<2x32xf32>
    %17 = vector.multi_reduction <add>, %16, %cst_7 [1] : vector<2x8x32xf32> to vector<2x32xf32>
    %18 = vector.shape_cast %17 : vector<2x32xf32> to vector<2x1x32xf32>
    %19 = math.tanh %18 : vector<2x1x32xf32>
    %c0_8 = arith.constant 0 : index
    %c0_9 = arith.constant 0 : index
    %c0_10 = arith.constant 0 : index
    %20 = vector.load %arg2[%c0_8, %c0_9, %c0_10] : memref<2x1x32xf32, #tpu.memory_space<vmem>>, vector<2x1x32xf32>
    tpu.vector_store %arg2[%c0_8, %c0_9, %c0_10], %19 {strides = array<i32>} : memref<2x1x32xf32, #tpu.memory_space<vmem>>, vector<2x1x32xf32>,
    return
  }
}

</mosaic_0001>

<bundles_post_ra>
// kernel: attention_forward.1
= control target key start
LH: loop header
LB: loop body
LE: loop exit
PB: predicated region body
PF: predicated region fallthrough
CT: control target
= control target key end

     0   :  { %7 = vsyncpa [#allocation3], 0  ;;  %s312_s0 = inlined_call_operand.hbm [shape: f32[2,1,32], index: 0, kind: input, shape index: {}]   ;;  %s313_s1 = inlined_call_operand.hbm [shape: f32[2,8,32], index: 1, kind: input, shape index: {}]   ;;  %s314_s2 = inlined_call_operand.hbm [shape: f32[2,1,32], index: 2, kind: output, shape index: {}]  }
   0x1   :  { %8 = vsyncpa [#allocation6], 0 }
   0x2   :  { %9 = vsyncpa [#allocation4], 0  ;;  %s14_s11 = sshll.u32 %s312_s0, 4  ;;  %s263_s12 = smov [#allocation2]   ;;  %s15_s11 = int_to_ptr.hbm [resolvable:$true] %s14_s11 }
   0x3   :  { %s16_s13 = sshll.u32 %s263_s12, 4  ;;  %s27_s16 = sshll.u32 %s313_s1, 4  ;;  %s17_s13 = int_to_ptr.vmem [resolvable:$true] %s16_s13  ;;  %s28_s16 = int_to_ptr.hbm [resolvable:$true] %s27_s16 }
   0x4   :  { %s264_s17 = smov 16   ;;  %s265_s18 = smov 1  }
   0x5   :  { %22 = dma.hbm_to_vmem [thread:$0]  %s15_s11, 32, %s17_s13, [#allocation3], %s264_s17, %s264_s17, %s265_s18  }
   0x6   :  { %s266_s19 = smov [#allocation5]   ;;  %s267_s21 = smov 128  }
   0x7   :  { %s29_s20 = sshll.u32 %s266_s19, 4  ;;  %s268_s0 = smov 8   ;;  %s30_s20 = int_to_ptr.vmem [resolvable:$true] %s29_s20 }
   0x8   :  { %35 = dma.hbm_to_vmem [thread:$0]  %s28_s16, 256, %s30_s20, [#allocation6], %s267_s21, %s267_s21, %s268_s0  }
   0x9   :  { %257 = dma.done.wait [#allocation3], 32  }
   0xa   :  { %258 = vsyncadd [#allocation3], 4294967264 }
   0xb   :  { %259 = dma.done.wait [#allocation6], 256  }
   0xc   :  { %260 = vsyncadd [#allocation6], 4294967040  ;;  %v294_v0 = vld [vmem:[#allocation5] sm:$0xff]  ;;  %v171_v1 = vld [vmem:[#allocation2] ss:$0 sm:$0xff]  ;;  %vm56_vm0 = vcmask 261120  }
   0xd   :  { %v54_v2 = vmul.f32 %v171_v1, %v294_v0  ;;  %v172_v3 = vld [vmem:[#allocation2 + $0x1] ss:$0 sm:$0xff]  ;;  %v297_v4 = vld [vmem:[#allocation5 + $0x8] sm:$0xff]  ;;  %vm141_vm9 = vcmask 253952   ;;  %s269_s1 = smov [#allocation7]   ;;  %s150_s25 = sshll.u32 %s314_s2, 4  ;;  %s151_s25 = int_to_ptr.hbm [resolvable:$true] %s150_s25 }
   0xe   :  { %v55_v6 = vmul.f32 %v172_v3, %v297_v4  ;;  %s148_s22 = sshll.u32 %s269_s1, 4  ;;  %s149_s22 = int_to_ptr.vmem [resolvable:$true] %s148_s22 }
   0xf   :  { %v57_v5 = vsel %vm56_vm0, %v54_v2, 0.0 }
  0x10   :  { %58 = vadd.xlane.f32.xlu0 %v57_v5  ;;  %v60_v7 = vsel %vm56_vm0, %v55_v6, 0.0 }
  0x18   :  { %61 = vadd.xlane.f32.xlu0 %v60_v7 }
  0x83   :  { %v59_v8 = vpop.xlane.xlu0 %58 }
  0x84   :  { %v63_v9 = vrot.slane %v59_v8, 4 }
  0x86   :  { %v64_v10 = vmax.f32 %v59_v8, %v63_v9 }
  0x88   :  { %v65_v11 = vrot.slane %v64_v10, 2 }
  0x8a   :  { %v66_v12 = vmax.f32 %v64_v10, %v65_v11 }
  0x8b   :  { %v62_v13 = vpop.xlane.xlu0 %61 }
  0x8c   :  { %v67_v14 = vrot.slane %v66_v12, 1  ;;  %v69_v15 = vrot.slane %v62_v13, 4 }
  0x8e   :  { %v68_v16 = vmax.f32 %v66_v12, %v67_v14  ;;  %v70_v17 = vmax.f32 %v62_v13, %v69_v15 }
  0x90   :  { %v75_v18 = vsub.f32 %v59_v8, %v68_v16  ;;  %v71_v19 = vrot.slane %v70_v17, 2 }
  0x92   :  { %v77_v20 = vmul.f32 1.442695, %v75_v18  ;;  %v72_v21 = vmax.f32 %v70_v17, %v71_v19 }
  0x94   :  { %173 = vpow2.f32 %v77_v20  ;;  %v73_v22 = vrot.slane %v72_v21, 1 }
  0x96   :  { %v74_v23 = vmax.f32 %v72_v21, %v73_v22 }
  0x98   :  { %v76_v24 = vsub.f32 %v62_v13, %v74_v23 }
  0x9a   :  { %v174_v25 = vpop.eup %173  ;;  %v79_v26 = vmul.f32 1.442695, %v76_v24 }
  0x9b   :  { %v81_v27 = vrot.slane %v174_v25, 4 }
  0x9c   :  { %175 = vpow2.f32 %v79_v26 }
  0x9d   :  { %v82_v28 = vadd.f32 %v174_v25, %v81_v27 }
  0x9f   :  { %v83_v29 = vrot.slane %v82_v28, 2 }
  0xa1   :  { %v84_v30 = vadd.f32 %v83_v29, %v82_v28 }
  0xa2   :  { %v176_v31 = vpop.eup %175 }
  0xa3   :  { %v85_v32 = vrot.slane %v84_v30, 1  ;;  %v87_v33 = vrot.slane %v176_v31, 4 }
  0xa5   :  { %v86_v34 = vadd.f32 %v85_v32, %v84_v30  ;;  %v88_v35 = vadd.f32 %v176_v31, %v87_v33 }
  0xa7   :  { %177 = vrcp.f32 %v86_v34  ;;  %v89_v36 = vrot.slane %v88_v35, 2  ;;  %v104_v43 = vand.u32 2147483648, %v86_v34  ;;  %v102_v45 = vand.u32 2147483647, %v86_v34 }
  0xa8   :  { %vm98_vm2 = vweird.f32 %v86_v34 }
  0xa9   :  { %v90_v37 = vadd.f32 %v89_v36, %v88_v35  ;;  %v105_v47 = vor.u32 1.1754944e-38, %v104_v43  ;;  %vm103_vm4 = vcmp.eq.f32.partialorder %v102_v45, 8.507059e+37 }
  0xab   :  { %v91_v38 = vrot.slane %v90_v37, 1 }
  0xad   :  { %v178_v39 = vpop.eup %177  ;;  %v92_v41 = vadd.f32 %v91_v38, %v90_v37 }
  0xae   :  { %v94_v40 = vmul.f32 %v178_v39, %v86_v34  ;;  %vm99_vm1 = vweird.f32 %v178_v39 }
  0xaf   :  { %179 = vrcp.f32 %v92_v41  ;;  %vm100_vm3 = vmor %vm98_vm2, %vm99_vm1  ;;  %v119_v55 = vand.u32 2147483648, %v92_v41  ;;  %v117_v57 = vand.u32 2147483647, %v92_v41  ;;  %vm113_vm6 = vweird.f32 %v92_v41 }
  0xb0   :  { %v95_v42 = vsub.f32 1.0, %v94_v40 }
  0xb1   :  { %v120_v61 = vor.u32 1.1754944e-38, %v119_v55  ;;  %vm118_vm8 = vcmp.eq.f32.partialorder %v117_v57, 8.507059e+37 }
  0xb2   :  { %v96_v44 = vmul.f32 %v178_v39, %v95_v42 }
  0xb4   :  { %v97_v46 = vadd.f32 %v178_v39, %v96_v44 }
  0xb5   :  { %v180_v48 = vpop.eup %179 }
  0xb6   :  { %v101_v49 = vsel %vm100_vm3, %v178_v39, %v97_v46  ;;  %v109_v51 = vmul.f32 %v180_v48, %v92_v41  ;;  %vm114_vm5 = vweird.f32 %v180_v48 }
  0xb7   :  { %v106_v50 = vsel %vm103_vm4, %v105_v47, %v101_v49  ;;  %vm115_vm7 = vmor %vm113_vm6, %vm114_vm5 }
  0xb8   :  { %v107_v52 = vmul.f32 %v174_v25, %v106_v50  ;;  %v110_v53 = vsub.f32 1.0, %v109_v51 }
  0xba   :  { %v123_v54 = vmul.f32 %v107_v52, %v294_v0  ;;  %v111_v56 = vmul.f32 %v180_v48, %v110_v53 }
  0xbc   :  { %v125_v58 = vsel %vm56_vm0, %v123_v54, 0.0  ;;  %v112_v60 = vadd.f32 %v180_v48, %v111_v56 }
  0xbd   :  { %v126_v59 = vrot.slane %v125_v58, 4 }
  0xbe   :  { %v116_v63 = vsel %vm115_vm7, %v180_v48, %v112_v60 }
  0xbf   :  { %v127_v62 = vadd.f32 %v126_v59, %v125_v58  ;;  %v121_v1 = vsel %vm118_vm8, %v120_v61, %v116_v63 }
  0xc0   :  { %v122_v2 = vmul.f32 %v176_v31, %v121_v1 }
  0xc1   :  { %v128_v3 = vrot.slane %v127_v62, 2 }
  0xc2   :  { %v124_v5 = vmul.f32 %v122_v2, %v297_v4 }
  0xc3   :  { %v129_v0 = vadd.f32 %v128_v3, %v127_v62 }
  0xc4   :  { %v132_v6 = vsel %vm56_vm0, %v124_v5, 0.0 }
  0xc5   :  { %v130_v7 = vrot.slane %v129_v0, 1  ;;  %v133_v8 = vrot.slane %v132_v6, 4 }
  0xc7   :  { %v131_v9 = vadd.f32 %v130_v7, %v129_v0  ;;  %v134_v10 = vadd.f32 %v133_v8, %v132_v6 }
  0xc9   :  { %181 = vtanh.f32 %v131_v9  ;;  %v135_v11 = vrot.slane %v134_v10, 2 }
  0xcb   :  { %v136_v12 = vadd.f32 %v135_v11, %v134_v10 }
  0xcd   :  { %v137_v13 = vrot.slane %v136_v12, 1 }
  0xcf   :  { %v182_v14 = vpop.eup %181  ;;  %v138_v15 = vadd.f32 %v137_v13, %v136_v12 }
  0xd0   :  { %142 = vst.msk [vmem:[#allocation7] sm:$0x1] %vm141_vm9, %v182_v14 }
  0xd1   :  { %183 = vtanh.f32 %v138_v15 }
  0xd7   :  { %v184_v4 = vpop.eup %183 }
  0xd8   :  { %143 = vst.msk [vmem:[#allocation7 + $0x1] sm:$0x1] %vm141_vm9, %v184_v4 }
  0xd9   :  { %156 = dma.vmem_to_hbm [thread:$0]  %s149_s22, 32, %s151_s25, [#allocation4], %s264_s17, %s264_s17, %s265_s18  }
  0xda   :  { %261 = dma.done.wait [#allocation4], 32  }
  0xdb   :  { %262 = vsyncadd [#allocation4], 4294967264 }
  0xdc   :  { %161 = vsyncpa [#allocation3], 1 }
  0xdd   :  { %162 = vsyncpa [#allocation6], 1 }
  0xde   :  { %163 = vsyncpa [#allocation4], 1 }

</bundles_post_ra>
